<compile_context>
chip_gen: v5e
topology: v5e:2x2
jax: 0.10.0
libtpu: 0.0.40
codegen_flags: <defaults>
</compile_context>

<pallas_src>
import jax
import jax.numpy as jnp
from jax.experimental import pallas as pl
from jax.experimental.pallas import tpu as pltpu


def _round_up(x, m):
    return ((x + m - 1) // m) * m


def _vmem_capacity_bytes():
    """Per-core VMEM capacity; conservative fallback if the query fails."""
    try:
        return int(pltpu.get_tpu_info().vmem_capacity_bytes)
    except Exception:
        return 64 * 2 ** 20  # v7x per-TensorCore VMEM (smallest generation)


def _resident_spec(block_shape):
    """BlockSpec for an operand resident in VMEM across the whole grid.

    index_map is constant, so double-buffering buys nothing -> single buffer.
    """
    try:
        return pl.BlockSpec(block_shape, lambda i: (0, 0),
                            pipeline_mode=pl.Buffered(1))
    except (TypeError, AttributeError):
        # Older jax without pipeline_mode: accept default double-buffering.
        return pl.BlockSpec(block_shape, lambda i: (0, 0))


def two_layer_kernel(x_ref, w1_ref, b1_ref, w2_ref, b2_ref, o_ref):
    # linear1: bf16 MXU inputs, f32 accumulation; bias + ReLU (clamp(min=0)) in f32.
    xb = x_ref[...].astype(w1_ref.dtype)
    h = jnp.dot(xb, w1_ref[...], preferred_element_type=jnp.float32)
    h = jnp.maximum(h + b1_ref[...], 0.0)
    # linear2: hidden downcast to bf16 for the MXU, f32 accumulation, f32 bias add.
    y = jnp.dot(h.astype(w2_ref.dtype), w2_ref[...],
                preferred_element_type=jnp.float32)
    o_ref[...] = (y + b2_ref[...]).astype(o_ref.dtype)


def prepare_params(w1, b1, w2, b2):
    """Pad (lane-align to 128) and cast the parameters ONCE at init time.

    Hoisted out of the per-call forward so the pad/convert passes are not paid
    on every call. Weights are stored [in, out] in bf16; biases [1, out] in f32.
    """
    D_in, H = w1.shape
    D_out = w2.shape[1]
    D_in_p, H_p, D_out_p = (_round_up(d, 128) for d in (D_in, H, D_out))

    w1p = jnp.zeros((D_in_p, H_p), jnp.bfloat16).at[:D_in, :H].set(
        w1.astype(jnp.bfloat16))
    b1p = jnp.zeros((1, H_p), jnp.float32).at[:, :H].set(
        b1.reshape(1, -1).astype(jnp.float32))
    w2p = jnp.zeros((H_p, D_out_p), jnp.bfloat16).at[:H, :D_out].set(
        w2.astype(jnp.bfloat16))
    b2p = jnp.zeros((1, D_out_p), jnp.float32).at[:, :D_out].set(
        b2.reshape(1, -1).astype(jnp.float32))

    dims = {"D_in": D_in, "H": H, "D_out": D_out,
            "D_in_p": D_in_p, "H_p": H_p, "D_out_p": D_out_p}
    return (w1p, b1p, w2p, b2p), dims


def two_layer_net(x, padded_params, dims, *, tile_n=1024):
    """y = relu(x @ w1 + b1) @ w2 + b2, fused in one Pallas TPU kernel."""
    w1p, b1p, w2p, b2p = padded_params
    N, D_in = x.shape
    D_in_p, H_p, D_out_p = dims["D_in_p"], dims["H_p"], dims["D_out_p"]
    D_out = dims["D_out"]
    assert D_in == dims["D_in"], "x feature dim does not match the parameters"

    # --- batch tile selection --------------------------------------------
    # Sanitize user tile_n to a multiple of 8 (sublane block constraint).
    tile_n = max(8, (int(tile_n) // 8) * 8)
    N8 = _round_up(N, 8)
    tile_n = min(tile_n, N8)
    # Guarantee >=2 grid steps when N allows, so the "parallel" axis can
    # shard across both v7x TensorCores (harmless no-op on v5e/v6e).
    if N8 >= 16 and N8 // tile_n < 2:
        tile_n = _round_up((N8 + 1) // 2, 8)

    # --- VMEM budget (per generation, with headroom) ------------------------
    resident_bytes = (w1p.size * w1p.dtype.itemsize
                      + w2p.size * w2p.dtype.itemsize
                      + b1p.size * 4 + b2p.size * 4)     # single-buffered
    x_itemsize = max(2, x.dtype.itemsize)

    def vmem_bytes(tn):
        return (resident_bytes
                + 2 * tn * D_in_p * x_itemsize   # x tile, double-buffered
                + 2 * tn * D_out_p * 4           # out tile, f32, double-buffered
                + tn * H_p * 4)                  # hidden activation, f32

    vmem_budget = int(0.85 * _vmem_capacity_bytes())
    while tile_n > 8 and vmem_bytes(tile_n) > vmem_budget:
        tile_n = max(8, (tile_n // 2 // 8) * 8)

    N_p = _round_up(N, tile_n)
    grid = (N_p // tile_n,)

    # --- input padding (only when the shape actually requires it) ----------
    if (N_p != N) or (D_in_p != D_in):
        # Fold the bf16 cast into the same padding pass.
        xp = jnp.zeros((N_p, D_in_p), jnp.bfloat16).at[:N, :D_in].set(
            x.astype(jnp.bfloat16))
    else:
        xp = x  # cast to bf16 happens inside the kernel

    cost = pl.CostEstimate(
        flops=int(2 * N_p * (D_in_p * H_p + H_p * D_out_p)),
        transcendentals=0,
        bytes_accessed=int(xp.size * xp.dtype.itemsize + resident_bytes
                           + N_p * D_out_p * 4),
    )

    out_p = pl.pallas_call(
        two_layer_kernel,
        out_shape=jax.ShapeDtypeStruct((N_p, D_out_p), jnp.float32),
        grid=grid,
        in_specs=[
            # x: one row tile per grid step (software pipelined, 2 buffers).
            pl.BlockSpec((tile_n, D_in_p), lambda i: (i, 0)),
            # Weights / biases: resident in VMEM, single-buffered.
            _resident_spec((D_in_p, H_p)),
            _resident_spec((1, H_p)),
            _resident_spec((H_p, D_out_p)),
            _resident_spec((1, D_out_p)),
        ],
        out_specs=pl.BlockSpec((tile_n, D_out_p), lambda i: (i, 0)),
        compiler_params=pltpu.CompilerParams(
            dimension_semantics=("parallel",),
            vmem_limit_bytes=vmem_budget,
        ),
        cost_estimate=cost,
    )(xp, w1p, b1p, w2p, b2p)

    # Slice off the N / D_out padding.
    return out_p[:N, :D_out].astype(x.dtype)


if __name__ == "__main__":
    # Shapes from the tutorial module: x [N, D_in] -> [N, D_out].
    N, D_in, H, D_out = 64, 1000, 100, 10

    key = jax.random.PRNGKey(0)
    kx, kw1, kb1, kw2, kb2 = jax.random.split(key, 5)

    x = jax.random.normal(kx, (N, D_in), dtype=jnp.float32)

    # Deterministic param init mimicking torch.nn.Linear's default
    # U(-1/sqrt(fan_in), 1/sqrt(fan_in)); stored already transposed to [in, out].
    lim1 = 1.0 / jnp.sqrt(jnp.float32(D_in))
    lim2 = 1.0 / jnp.sqrt(jnp.float32(H))
    w1 = jax.random.uniform(kw1, (D_in, H), jnp.float32, -lim1, lim1)
    b1 = jax.random.uniform(kb1, (1, H), jnp.float32, -lim1, lim1)
    w2 = jax.random.uniform(kw2, (H, D_out), jnp.float32, -lim2, lim2)
    b2 = jax.random.uniform(kb2, (1, D_out), jnp.float32, -lim2, lim2)

    # Parameter padding / bf16 cast is done once, outside the forward pass.
    padded_params, dims = prepare_params(w1, b1, w2, b2)
    padded_params = jax.block_until_ready(padded_params)

    y = two_layer_net(x, padded_params, dims)
    y = jax.block_until_ready(y)
    assert y.shape == (N, D_out)

    # Reference 1: emulate the kernel's bf16-input / f32-accumulate path.
    h_ref = jnp.maximum(
        jnp.dot(x.astype(jnp.bfloat16), w1.astype(jnp.bfloat16),
                preferred_element_type=jnp.float32) + b1, 0.0)
    y_ref_bf16 = jnp.dot(h_ref.astype(jnp.bfloat16), w2.astype(jnp.bfloat16),
                         preferred_element_type=jnp.float32) + b2
    assert jnp.allclose(y, y_ref_bf16, atol=2e-3, rtol=2e-3)

    # Reference 2: pure f32 forward (module semantics), bf16-appropriate tolerance.
    y_ref_f32 = jnp.maximum(x @ w1 + b1, 0.0) @ w2 + b2
    assert jnp.allclose(y, y_ref_f32, atol=5e-2, rtol=5e-2)

    print("KERNEL_OK")
</pallas_src>

<mosaic_0001>
module attributes {stable_mosaic.version = 11 : i64} {
  func.func @two_layer_kernel(%arg0: i32, %arg1: memref<32x1024xbf16, #tpu.memory_space<vmem>>, %arg2: memref<1024x128xbf16, #tpu.memory_space<vmem>>, %arg3: memref<1x128xf32, #tpu.memory_space<vmem>>, %arg4: memref<128x128xbf16, #tpu.memory_space<vmem>>, %arg5: memref<1x128xf32, #tpu.memory_space<vmem>>, %arg6: memref<32x128xf32, #tpu.memory_space<vmem>>) attributes {dimension_semantics = [#tpu.dimension_semantics<parallel>], iteration_bounds = array<i64: 2>, scalar_prefetch = 0 : i64, scratch_operands = 0 : i64, tpu.core_type = #tpu.core_type<tc>, window_params = [{transform_indices = @transform_0, window_bounds = array<i64: 32, 1024>}, {pipeline_mode = #tpu.pipeline_mode<synchronous>, transform_indices = @transform_1, window_bounds = array<i64: 1024, 128>}, {pipeline_mode = #tpu.pipeline_mode<synchronous>, transform_indices = @transform_2, window_bounds = array<i64: 1, 128>}, {pipeline_mode = #tpu.pipeline_mode<synchronous>, transform_indices = @transform_3, window_bounds = array<i64: 128, 128>}, {pipeline_mode = #tpu.pipeline_mode<synchronous>, transform_indices = @transform_4, window_bounds = array<i64: 1, 128>}, {transform_indices = @transform_5, window_bounds = array<i64: 32, 128>}]} {
    %c0 = arith.constant 0 : index
    %c0_0 = arith.constant 0 : index
    %0 = vector.load %arg1[%c0, %c0_0] : memref<32x1024xbf16, #tpu.memory_space<vmem>>, vector<32x1024xbf16>
    %c0_1 = arith.constant 0 : index
    %c0_2 = arith.constant 0 : index
    %1 = vector.load %arg2[%c0_1, %c0_2] : memref<1024x128xbf16, #tpu.memory_space<vmem>>, vector<1024x128xbf16>
    %cst = arith.constant dense<0.000000e+00> : vector<32x128xf32>
    %2 = tpu.matmul %0, %1, %cst {dimension_numbers = #tpu.dot_dimension_numbers<[1], [0], [0], [1], [0, 0, 1, 1], [], []>} : vector<32x1024xbf16>, vector<1024x128xbf16>, vector<32x128xf32> -> vector<32x128xf32>
    %c0_3 = arith.constant 0 : index
    %c0_4 = arith.constant 0 : index
    %3 = vector.load %arg3[%c0_3, %c0_4] : memref<1x128xf32, #tpu.memory_space<vmem>>, vector<1x128xf32>
    %4 = vector.broadcast %3 : vector<1x128xf32> to vector<32x128xf32>
    %5 = arith.addf %2, %4 : vector<32x128xf32>
    %cst_5 = arith.constant 0.000000e+00 : f32
    %6 = vector.broadcast %cst_5 : f32 to vector<32x128xf32>
    %7 = arith.maximumf %5, %6 : vector<32x128xf32>
    %8 = arith.truncf %7 : vector<32x128xf32> to vector<32x128xbf16>
    %c0_6 = arith.constant 0 : index
    %c0_7 = arith.constant 0 : index
    %9 = vector.load %arg4[%c0_6, %c0_7] : memref<128x128xbf16, #tpu.memory_space<vmem>>, vector<128x128xbf16>
    %cst_8 = arith.constant dense<0.000000e+00> : vector<32x128xf32>
    %10 = tpu.matmul %8, %9, %cst_8 {dimension_numbers = #tpu.dot_dimension_numbers<[1], [0], [0], [1], [0, 0, 1, 1], [], []>} : vector<32x128xbf16>, vector<128x128xbf16>, vector<32x128xf32> -> vector<32x128xf32>
    %c0_9 = arith.constant 0 : index
    %c0_10 = arith.constant 0 : index
    %11 = vector.load %arg5[%c0_9, %c0_10] : memref<1x128xf32, #tpu.memory_space<vmem>>, vector<1x128xf32>
    %12 = vector.broadcast %11 : vector<1x128xf32> to vector<32x128xf32>
    %13 = arith.addf %10, %12 : vector<32x128xf32>
    %c0_11 = arith.constant 0 : index
    %c0_12 = arith.constant 0 : index
    %14 = vector.load %arg6[%c0_11, %c0_12] : memref<32x128xf32, #tpu.memory_space<vmem>>, vector<32x128xf32>
    tpu.vector_store %arg6[%c0_11, %c0_12], %13 {strides = array<i32>} : memref<32x128xf32, #tpu.memory_space<vmem>>, vector<32x128xf32>,
    return
  }
  func.func @transform_0(%arg0: i32) -> (i32, i32) {
    %c0_i32 = arith.constant 0 : i32
    %c0_i32_0 = arith.constant 0 : i32
    return %arg0, %c0_i32 : i32, i32
  }
  func.func @transform_1(%arg0: i32) -> (i32, i32) {
    %c0_i32 = arith.constant 0 : i32
    %c0_i32_0 = arith.constant 0 : i32
    %c0_i32_1 = arith.constant 0 : i32
    return %c0_i32, %c0_i32_0 : i32, i32
  }
  func.func @transform_2(%arg0: i32) -> (i32, i32) {
    %c0_i32 = arith.constant 0 : i32
    %c0_i32_0 = arith.constant 0 : i32
    %c0_i32_1 = arith.constant 0 : i32
    return %c0_i32, %c0_i32_0 : i32, i32
  }
  func.func @transform_3(%arg0: i32) -> (i32, i32) {
    %c0_i32 = arith.constant 0 : i32
    %c0_i32_0 = arith.constant 0 : i32
    %c0_i32_1 = arith.constant 0 : i32
    return %c0_i32, %c0_i32_0 : i32, i32
  }
  func.func @transform_4(%arg0: i32) -> (i32, i32) {
    %c0_i32 = arith.constant 0 : i32
    %c0_i32_0 = arith.constant 0 : i32
    %c0_i32_1 = arith.constant 0 : i32
    return %c0_i32, %c0_i32_0 : i32, i32
  }
  func.func @transform_5(%arg0: i32) -> (i32, i32) {
    %c0_i32 = arith.constant 0 : i32
    %c0_i32_0 = arith.constant 0 : i32
    return %arg0, %c0_i32 : i32, i32
  }
}

</mosaic_0001>

<bundles_post_ra>
// kernel: tpu_custom_call.1
= control target key start
LH: loop header
LB: loop body
LE: loop exit
PB: predicated region body
PF: predicated region fallthrough
CT: control target
= control target key end

     0   :  { %10 = vsyncpa [#allocation3], 0  ;;  %s2177_s0 = inlined_call_operand.hbm [shape: bf16[64,1024], index: 0, kind: input, shape index: {}]   ;;  %s2178_s1 = inlined_call_operand.hbm [shape: bf16[1024,128], index: 1, kind: input, shape index: {}]   ;;  %s2179_s2 = inlined_call_operand.vmem [shape: f32[1,128], index: 2, kind: input, shape index: {}]   ;;  %s2180_s3 = inlined_call_operand.hbm [shape: bf16[128,128], index: 3, kind: input, shape index: {}]   ;;  %s2181_s4 = inlined_call_operand.vmem [shape: f32[1,128], index: 4, kind: input, shape index: {}]   ;;  %s2182_s5 = inlined_call_operand.hbm [shape: f32[64,128], index: 5, kind: output, shape index: {}]  }
   0x1   :  { %12 = vsyncpa [#allocation3 + $0x1], 0 }
   0x2   :  { %13 = vsyncpa [#allocation6], 0 }
   0x3   :  { %14 = vsyncpa [#allocation4], 0 }
   0x4   :  { %16 = vsyncpa [#allocation4 + $0x1], 0  ;;  %s1995_s18 = smov 0   ;;  %s1997_s19 = smov 0  }
   0x5   :  { %s1999_s20 = smov 0   ;;  %s2001_s21 = smov 0  }
   0x6 LB: > { %s2016_s22 = sadd.s32 4294967295, %s1955_s21   ;;  %s1250_s23 = sadd.s32 4294967294, %s1955_s21   ;;  %s1955_s21 = sphi %s2001_s21, %s2192_s21   ;;  %s1951_s20 = sphi %s1999_s20, %s2191_s20   ;;  %s1947_s19 = sphi %s1997_s19, %s2190_s19   ;;  %s1943_s18 = sphi %s1995_s18, %s2189_s18  }
   0x7   : > { %p42_p0 = scmp.ne.s32.totalorder %s1947_s19, %s1943_s18  ;;  %p43_p1 = scmp.eq.s32.totalorder %s2016_s22, 0 }
   0x8   : > { %p150_p2 = scmp.eq.s32.totalorder %s2016_s22, 1  ;;  %p156_p3 = scmp.eq.s32.totalorder %s1250_s23, 1 }
   0x9   : > { %p2025_p4 = por %p43_p1, %p42_p0  ;;  %p1251_p5 = scmp.ge.s32.totalorder %s1955_s21, 1 }
   0xa   : > { %p2030_p6 = por %p156_p3, %p42_p0  ;;  %p163_p7 = scmp.lt.s32.totalorder %s1955_s21, 3 }
   0xb   : > { %s174_s28 = sshll.u32 %s2178_s1, 4  ;;  %s1957_s30 = smov [#allocation5]   ;;  %s175_s28 = int_to_ptr.hbm [resolvable:$true] %s174_s28 }
   0xc   : > { %p2038_p8 = pnand %p1251_p5, %p163_p7  ;;  %s176_s6 = sshll.u32 %s1957_s30, 4  ;;  %s177_s6 = int_to_ptr.vmem [resolvable:$true] %s176_s6 }
   0xd   : > { %s191_s9 = sshll.u32 %s2180_s3, 4  ;;  %s1958_s10 = smov 64   ;;  %s192_s9 = int_to_ptr.hbm [resolvable:$true] %s191_s9 }
   0xe   : > { %p1732_p9 = pneg %p2038_p8  ;;  %s1959_s11 = smov 4  }
   0xf   : > { %s1960_s12 = smov [#allocation7]   ;;  %s2051_s14 = sadd.s32 1, %s1955_s21  }
  0x10   : > { %p1733_p10 = pnand %p1732_p9, %p43_p1  ;;  %s193_s13 = sshll.u32 %s1960_s12, 4  ;;  %s194_s13 = int_to_ptr.vmem [resolvable:$true] %s193_s13 }
  0x11   : > { %s29_s15 = sadd.s32 1, %s1951_s20  ;;  %s26_s16 = ssub.s32 %s1955_s21, %s2051_s14 }
  0x12   : > { %1735 = dma.hbm_to_vmem [thread:$0]  (!%p1733_p10), %s175_s28, 8192, %s177_s6, [#allocation6], %s1958_s10, %s1958_s10, %s1959_s11  }
  0x13   : > { %1738 = dma.hbm_to_vmem [thread:$0]  (!%p1733_p10), %s192_s9, 1024, %s194_s13, [#allocation6], %s1958_s10, %s1958_s10, %s1959_s11  }
  0x14   : > { %p36_p12 = scmp.ne.s32.totalorder %s1951_s20, %s1947_s19  ;;  %p27_p13 = scmp.eq.s32.totalorder %s26_s16, 0 }
  0x15   : > { %p37_p0 = scmp.eq.s32.totalorder %s1955_s21, 0  ;;  %p1749_p5 = scmp.lt.s32.totalorder %s1955_s21, 2 }
  0x16   : > { %p2061_p3 = por %p150_p2, %p36_p12  ;;  %s210_s26 = sand.u32 1, %s1951_s20  }
  0x17   : > { %s2067_s23 = scalar_select %p27_p13, %s1951_s20, %s29_s15  }
  0x18   : > { %p38_p7 = por %p37_p0, %p36_p12  ;;  %s1255_s27 = sshll.u32 %s210_s26, 7 }
  0x19   : > { %s1622_s28 = sshll.u32 %s1955_s21, 7  ;;  %s214_s8 = scalar_lea.vmem [#allocation2], %s1255_s27 }
  0x1a   : > { %s220_s7 = scalar_lea.hbm %s2177_s0, %s1622_s28  ;;  %s223_s9 = sshll.u32 %s214_s8, 4  ;;  %s224_s9 = int_to_ptr.vmem [resolvable:$true] %s223_s9 }
  0x1b   : > { %s221_s10 = sshll.u32 %s220_s7, 4  ;;  %p2074_p2 = pnand %p1749_p5, %p38_p7  ;;  %s222_s10 = int_to_ptr.hbm [resolvable:$true] %s221_s10 }
  0x1c   : > { %s211_s12 = scalar_lea.sflag [#allocation3], %s210_s26  ;;  %s1855_s13 = sshra.s32 %s222_s10, 4  ;;  %s1856_s13 = int_to_ptr.hbm [resolvable:$true] %s1855_s13 }
  0x1d   : > { %s1857_s15 = scalar_lea.hbm %s1856_s13, 128  ;;  %p1859_p10 = pneg %p2074_p2 }
  0x1e   : > { %p1858_p9 = scmp.ne.s32.totalorder %s1856_s13, %s1857_s15  ;;  %s1862_s28 = scalar_lea.hbm %s2177_s0, 256 }
  0x1f   : > { %p1863_p0 = scmp.lt.s32.totalorder %s1856_s13, %s2177_s0  ;;  %p1864_p5 = scmp.lt.s32.totalorder %s1862_s28, %s1857_s15 }
  0x20   : > { %p1860_p12 = pnand %p1859_p10, %p1858_p9 }
  0x21   : > { %p1865_p7 = por %p1864_p5, %p1863_p0 }
  0x22   : > { %p1861_p13 = pneg %p1860_p12 }
  0x24   : > { %p1866_p11 = pnand %p1865_p7, %p1861_p13 }
  0x26   : > { %1869 = shalt.err (!%p1866_p11)
}
  0x27   : > { %s1961_s26 = smov 512   ;;  %s1962_s7 = smov 32  }
  0x28   : > { %1742 = dma.hbm_to_vmem [thread:$0]  (!%p2074_p2), %s222_s10, 2048, %s224_s9, %s211_s12, %s1961_s26, %s1961_s26, %s1962_s7  }
  0x29   : > { %235 = sbr.rel (%p2038_p8) target bundleno = 419 (0x1a3), region = 40  ;;  %s2091_s8 = sand.u32 (!%p2038_p8), 1, %s1947_s19  }
  0x2a   : > { %s1260_s16 = sshll.u32 (!%p2038_p8), %s2091_s8, 7  ;;  %s238_s13 = scalar_lea.sflag (!%p2038_p8), [#allocation3], %s2091_s8 }
  0x2b   : > { %s2095_s15 = scalar_lea.vmem (!%p2038_p8), [#allocation2], %s1260_s16 }
  0x2e   : > { %1930 = dma.done.wait (%p2025_p4), %s238_s13, 2048  }
  0x2f   : > { %1932 = vsyncadd (%p2025_p4), %s238_s13, 4294965248 }
  0x30   : > { %1934 = dma.done.wait (%p43_p1), [#allocation6], 9216  }
  0x31   : > { %1936 = vsyncadd (%p43_p1), [#allocation6], 4294958080  ;;  %v1646_v0 = vld [vmem:[#allocation5 + $0x38] sm:$0xff]  ;;  %v1645_v4 = vld [vmem:[#allocation5 + $0x30] sm:$0xff]  ;;  %s1263_s9 = sshll.u32 %s2091_s8, 5  ;;  %s1711_s27 = sshll.u32 %s2016_s22, 5 }
  0x32   : > { %v1654_v1 = vld [vmem:[#allocation5 + $0x78] sm:$0xff]  ;;  %893 = vmatpush.bf16.msra.mxu0 %v1646_v0  ;;  %v1653_v5 = vld [vmem:[#allocation5 + $0x70] sm:$0xff]  ;;  %v1644_v8 = vld [vmem:[#allocation5 + $0x28] sm:$0xff]  ;;  %s278_s12 = scalar_lea.vmem [#allocation8], %s1263_s9  ;;  %s1154_s6 = scalar_lea.hbm %s2182_s5, %s1711_s27 }
  0x33   : > { %v1662_v2 = vld [vmem:[#allocation5 + $0xb8] sm:$0xff]  ;;  %912 = vmatpush.bf16.msra.mxu1 %v1654_v1  ;;  %v1661_v6 = vld [vmem:[#allocation5 + $0xb0] sm:$0xff]  ;;  %v1652_v9 = vld [vmem:[#allocation5 + $0x68] sm:$0xff]  ;;  %s1155_s26 = sshll.u32 %s278_s12, 4  ;;  %s1157_s7 = sshll.u32 %s1154_s6, 4  ;;  %s1156_s26 = int_to_ptr.vmem [resolvable:$true] %s1155_s26  ;;  %s1158_s7 = int_to_ptr.hbm [resolvable:$true] %s1157_s7 }
  0x34   : > { %v1670_v3 = vld [vmem:[#allocation5 + $0xf8] sm:$0xff]  ;;  %931 = vmatpush.bf16.msra.mxu2 %v1662_v2  ;;  %v1669_v7 = vld [vmem:[#allocation5 + $0xf0] sm:$0xff]  ;;  %v1660_v10 = vld [vmem:[#allocation5 + $0xa8] sm:$0xff]  ;;  %s1143_s16 = scalar_lea.sflag [#allocation4], %s2091_s8  ;;  %s1899_s13 = sshra.s32 %s1158_s7, 4  ;;  %s1900_s13 = int_to_ptr.hbm [resolvable:$true] %s1899_s13 }
  0x35   : > { %950 = vmatpush.bf16.msra.mxu3 %v1670_v3  ;;  %v1668_v11 = vld [vmem:[#allocation5 + $0xe8] sm:$0xff]  ;;  %v1643_v12 = vld [vmem:[#allocation5 + $0x20] sm:$0xff]  ;;  %v1642_v16 = vld [vmem:[#allocation5 + $0x18] sm:$0xff]  ;;  %s1905_s29 = scalar_lea.hbm %s2182_s5, 64  ;;  %p1906_p11 = scmp.lt.s32.totalorder %s1900_s13, %s2182_s5 }
  0x36   : > { %894 = vmatpush.bf16.msra.mxu0 %v1645_v4  ;;  %v1651_v13 = vld [vmem:[#allocation5 + $0x60] sm:$0xff]  ;;  %v1650_v17 = vld [vmem:[#allocation5 + $0x58] sm:$0xff]  ;;  %v1641_v20 = vld [vmem:[#allocation5 + $0x10] sm:$0xff] }
  0x37   : > { %913 = vmatpush.bf16.msra.mxu1 %v1653_v5  ;;  %v1659_v14 = vld [vmem:[#allocation5 + $0xa0] sm:$0xff]  ;;  %v1658_v18 = vld [vmem:[#allocation5 + $0x98] sm:$0xff]  ;;  %v1649_v21 = vld [vmem:[#allocation5 + $0x50] sm:$0xff] }
  0x38   : > { %932 = vmatpush.bf16.msra.mxu2 %v1661_v6  ;;  %v1667_v15 = vld [vmem:[#allocation5 + $0xe0] sm:$0xff]  ;;  %v1666_v19 = vld [vmem:[#allocation5 + $0xd8] sm:$0xff]  ;;  %v1657_v22 = vld [vmem:[#allocation5 + $0x90] sm:$0xff] }
  0x39   : > { %951 = vmatpush.bf16.msra.mxu3 %v1669_v7  ;;  %v1665_v23 = vld [vmem:[#allocation5 + $0xd0] sm:$0xff]  ;;  %v1640_v24 = vld [vmem:[#allocation5 + $0x8] sm:$0xff]  ;;  %v1639_v28 = vld [vmem:[#allocation5] sm:$0xff] }
  0x3a   : > { %895 = vmatpush.bf16.msra.mxu0 %v1644_v8  ;;  %v1648_v25 = vld [vmem:[#allocation5 + $0x48] sm:$0xff]  ;;  %v1647_v29 = vld [vmem:[#allocation5 + $0x40] sm:$0xff]  ;;  %v1694_v40 = vld [vmem:[#allocation5 + $0x1b8] sm:$0xff] }
  0x3b   : > { %914 = vmatpush.bf16.msra.mxu1 %v1652_v9  ;;  %v1656_v26 = vld [vmem:[#allocation5 + $0x88] sm:$0xff]  ;;  %v1266_v30 = vld [vmem:[%s2095_s15] sm:$0xf]  ;;  %v1623_v34 = vld [vmem:[%s2095_s15 + $0x4] sm:$0xf] }
  0x3c   : > { %933 = vmatpush.bf16.msra.mxu2 %v1660_v10  ;;  %v1664_v27 = vld [vmem:[#allocation5 + $0xc8] sm:$0xff]  ;;  %v1655_v31 = vld [vmem:[#allocation5 + $0x80] sm:$0xff]  ;;  %v1678_v41 = vld [vmem:[#allocation5 + $0x138] sm:$0xff] }
  0x3d   : > { %952 = vmatpush.bf16.msra.mxu3 %v1668_v11  ;;  %v1663_v32 = vld [vmem:[#allocation5 + $0xc0] sm:$0xff]  ;;  %v1274_v36 = vld [vmem:[%s2095_s15 + $0x8] sm:$0xf]  ;;  %v1624_v38 = vld [vmem:[%s2095_s15 + $0xc] sm:$0xf] }
  0x3e   : > { %896 = vmatpush.bf16.msra.mxu0 %v1643_v12  ;;  %v1627_v33 = vld [vmem:[%s2095_s15 + $0x1c] sm:$0xf0]  ;;  %v1268_v35 = vld [vmem:[%s2095_s15 + $0x20] sm:$0xf0]  ;;  %v1628_v37 = vld [vmem:[%s2095_s15 + $0x24] sm:$0xf0] }
  0x3f   : > { %915 = vmatpush.bf16.msra.mxu1 %v1651_v13  ;;  %v1276_v39 = vld [vmem:[%s2095_s15 + $0x28] sm:$0xf0]  ;;  %v1267_v42 = vor.u32 %v1627_v33, %v1266_v30  ;;  %v1271_v43 = vor.u32 %v1623_v34, %v1268_v35  ;;  %v1275_v44 = vor.u32 %v1628_v37, %v1274_v36  ;;  %v1686_v46 = vld [vmem:[#allocation5 + $0x178] sm:$0xff]  ;;  %v1693_v48 = vld [vmem:[#allocation5 + $0x1b0] sm:$0xff] }
  0x40   : > { %934 = vmatpush.bf16.msra.mxu2 %v1659_v14  ;;  %v1279_v45 = vor.u32 %v1624_v38, %v1276_v39  ;;  %v1702_v47 = vld [vmem:[#allocation5 + $0x1f8] sm:$0xff]  ;;  %v1677_v49 = vld [vmem:[#allocation5 + $0x130] sm:$0xff]  ;;  %v1692_v52 = vld [vmem:[#allocation5 + $0x1a8] sm:$0xff] }
  0x41   : > { %953 = vmatpush.bf16.msra.mxu3 %v1667_v15  ;;  %v1685_v50 = vld [vmem:[#allocation5 + $0x170] sm:$0xff]  ;;  %v1676_v53 = vld [vmem:[#allocation5 + $0x128] sm:$0xff]  ;;  %v1691_v56 = vld [vmem:[#allocation5 + $0x1a0] sm:$0xff] }
  0x42   : > { %897 = vmatpush.bf16.msra.mxu0 %v1642_v16  ;;  %v1701_v51 = vld [vmem:[#allocation5 + $0x1f0] sm:$0xff]  ;;  %v1684_v54 = vld [vmem:[#allocation5 + $0x168] sm:$0xff]  ;;  %v1675_v57 = vld [vmem:[#allocation5 + $0x120] sm:$0xff] }
  0x43   : > { %916 = vmatpush.bf16.msra.mxu1 %v1650_v17  ;;  %v1700_v55 = vld [vmem:[#allocation5 + $0x1e8] sm:$0xff]  ;;  %v1683_v58 = vld [vmem:[#allocation5 + $0x160] sm:$0xff]  ;;  %v1690_v4 = vld [vmem:[#allocation5 + $0x198] sm:$0xff] }
  0x44   : > { %935 = vmatpush.bf16.msra.mxu2 %v1658_v18  ;;  %v1699_v59 = vld [vmem:[#allocation5 + $0x1e0] sm:$0xff]  ;;  %v1306_v0 = vld [vmem:[%s2095_s15 + $0x48] sm:$0xf]  ;;  %v1632_v2 = vld [vmem:[%s2095_s15 + $0x4c] sm:$0xf] }
  0x45   : > { %954 = vmatpush.bf16.msra.mxu3 %v1666_v19  ;;  %v1298_v60 = vld [vmem:[%s2095_s15 + $0x40] sm:$0xf]  ;;  %v1631_v62 = vld [vmem:[%s2095_s15 + $0x44] sm:$0xf]  ;;  %v1636_v1 = vld [vmem:[%s2095_s15 + $0x64] sm:$0xf0] }
  0x46   : > { %898 = vmatpush.bf16.msra.mxu0 %v1641_v20  ;;  %v1635_v61 = vld [vmem:[%s2095_s15 + $0x5c] sm:$0xf0]  ;;  %v1300_v63 = vld [vmem:[%s2095_s15 + $0x60] sm:$0xf0]  ;;  %v1308_v3 = vld [vmem:[%s2095_s15 + $0x68] sm:$0xf0]  ;;  %v1307_v8 = vor.u32 %v1636_v1, %v1306_v0 }
  0x47   : > { %917 = vmatpush.bf16.msra.mxu1 %v1649_v21  ;;  %v1674_v5 = vld [vmem:[#allocation5 + $0x118] sm:$0xff]  ;;  %v1299_v6 = vor.u32 %v1635_v61, %v1298_v60  ;;  %v1303_v7 = vor.u32 %v1631_v62, %v1300_v63  ;;  %v1311_v9 = vor.u32 %v1632_v2, %v1308_v3  ;;  %v1689_v12 = vld [vmem:[#allocation5 + $0x190] sm:$0xff]  ;;  %v1688_v16 = vld [vmem:[#allocation5 + $0x188] sm:$0xff] }
  0x48   : > { %936 = vmatpush.bf16.msra.mxu2 %v1657_v22  ;;  %v1682_v10 = vld [vmem:[#allocation5 + $0x158] sm:$0xff]  ;;  %v1673_v13 = vld [vmem:[#allocation5 + $0x110] sm:$0xff]  ;;  %v1672_v17 = vld [vmem:[#allocation5 + $0x108] sm:$0xff] }
  0x49   : > { %955 = vmatpush.bf16.msra.mxu3 %v1665_v23  ;;  %v1698_v11 = vld [vmem:[#allocation5 + $0x1d8] sm:$0xff]  ;;  %v1681_v14 = vld [vmem:[#allocation5 + $0x150] sm:$0xff]  ;;  %v1680_v18 = vld [vmem:[#allocation5 + $0x148] sm:$0xff] }
  0x4a   : > { %899 = vmatpush.bf16.msra.mxu0 %v1640_v24  ;;  %v1697_v15 = vld [vmem:[#allocation5 + $0x1d0] sm:$0xff]  ;;  %v1696_v19 = vld [vmem:[#allocation5 + $0x1c8] sm:$0xff]  ;;  %v1687_v20 = vld [vmem:[#allocation5 + $0x180] sm:$0xff] }
  0x4b   : > { %918 = vmatpush.bf16.msra.mxu1 %v1648_v25  ;;  %v1671_v21 = vld [vmem:[#allocation5 + $0x100] sm:$0xff]  ;;  %v1282_v24 = vld [vmem:[%s2095_s15 + $0x10] sm:$0xf]  ;;  %v1626_v30 = vld [vmem:[%s2095_s15 + $0x1c] sm:$0xf] }
  0x4c   : > { %937 = vmatpush.bf16.msra.mxu2 %v1656_v26  ;;  %v1679_v22 = vld [vmem:[#allocation5 + $0x140] sm:$0xff]  ;;  %v1629_v25 = vld [vmem:[%s2095_s15 + $0x2c] sm:$0xf0]  ;;  %v1625_v26 = vld [vmem:[%s2095_s15 + $0x14] sm:$0xf] }
  0x4d   : > { %956 = vmatpush.bf16.msra.mxu3 %v1664_v27  ;;  %v1695_v23 = vld [vmem:[#allocation5 + $0x1c0] sm:$0xff]  ;;  %v1284_v27 = vld [vmem:[%s2095_s15 + $0x30] sm:$0xf0]  ;;  %v1314_v36 = vld [vmem:[%s2095_s15 + $0x50] sm:$0xf] }
  0x4e   : > { %900 = vmatpush.bf16.msra.mxu0 %v1639_v28  ;;  %v1290_v28 = vld [vmem:[%s2095_s15 + $0x18] sm:$0xf]  ;;  %v1287_v33 = vor.u32 %v1625_v26, %v1284_v27  ;;  %v1637_v37 = vld [vmem:[%s2095_s15 + $0x6c] sm:$0xf0]  ;;  %v1633_v38 = vld [vmem:[%s2095_s15 + $0x54] sm:$0xf] }
  0x4f   : > { %919 = vmatpush.bf16.msra.mxu1 %v1647_v29  ;;  %v1630_v29 = vld [vmem:[%s2095_s15 + $0x34] sm:$0xf0]  ;;  %v1316_v39 = vld [vmem:[%s2095_s15 + $0x70] sm:$0xf0]  ;;  %v1704_v0 = vld [vmem:[#allocation7 + $0x8] sm:$0xff] }
  0x50   : > { %938 = vmatpush.bf16.msra.mxu2 %v1655_v31  ;;  %v1292_v31 = vld [vmem:[%s2095_s15 + $0x38] sm:$0xf0]  ;;  %v1291_v34 = vor.u32 %v1630_v29, %v1290_v28  ;;  %v1793_v1 = vld [vmem:[%s2179_s2] ss:$0 sm:$0xff] }
  0x51   : > { %957 = vmatpush.bf16.msra.mxu3 %v1663_v32  ;;  %901 = vmatmul.bf16.vlgmr.msra.gmra.mxu0 %v1267_v42  ;;  %v1283_v32 = vor.u32 %v1629_v25, %v1282_v24  ;;  %v1295_v35 = vor.u32 %v1626_v30, %v1292_v31  ;;  %v1634_v42 = vld [vmem:[%s2095_s15 + $0x5c] sm:$0xf]  ;;  %v1703_v2 = vld [vmem:[#allocation7] sm:$0xff] }
  0x52   : > { %969 = vmatpush.bf16.msrb.mxu0 %v1678_v41  ;;  %920 = vmatmul.bf16.vlgmr.msra.gmra.mxu1 %v1271_v43  ;;  %v1638_v41 = vld [vmem:[%s2095_s15 + $0x74] sm:$0xf0]  ;;  %v1324_v43 = vld [vmem:[%s2095_s15 + $0x78] sm:$0xf0] }
  0x53   : > { %939 = vmatmul.bf16.vlgmr.msra.gmra.mxu2 %v1275_v44  ;;  %988 = vmatpush.bf16.msrb.mxu1 %v1686_v46  ;;  %v1315_v44 = vor.u32 %v1637_v37, %v1314_v36 }
  0x54   : > { %1007 = vmatpush.bf16.msrb.mxu2 %v1694_v40  ;;  %958 = vmatmul.bf16.vlgmr.msra.gmra.mxu3 %v1279_v45  ;;  %v1322_v40 = vld [vmem:[%s2095_s15 + $0x58] sm:$0xf]  ;;  %v1319_v45 = vor.u32 %v1633_v38, %v1316_v39  ;;  %s1901_s15 = scalar_lea.hbm %s1900_s13, 32 }
  0x55   : > { %1026 = vmatpush.bf16.msrb.mxu3 %v1702_v47  ;;  %v1323_v46 = vor.u32 %v1638_v41, %v1322_v40  ;;  %v1327_v47 = vor.u32 %v1634_v42, %v1324_v43  ;;  %p1902_p1 = scmp.ne.s32.totalorder %s1900_s13, %s1901_s15  ;;  %p1907_p2 = scmp.lt.s32.totalorder %s1905_s29, %s1901_s15 }
  0x56   : > { %970 = vmatpush.bf16.msrb.mxu0 %v1677_v49  ;;  %v1709_v49 = vld [vmem:[#allocation7 + $0x30] sm:$0xff] }
  0x57   : > { %989 = vmatpush.bf16.msrb.mxu1 %v1685_v50  ;;  %p1903_p4 = pnand %p1902_p1, %p2061_p3  ;;  %p1908_p9 = por %p1907_p2, %p1906_p11 }
  0x58   : > { %1008 = vmatpush.bf16.msrb.mxu2 %v1693_v48  ;;  %v1710_v48 = vld [vmem:[#allocation7 + $0x38] sm:$0xff] }
  0x59   : > { %1027 = vmatpush.bf16.msrb.mxu3 %v1701_v51  ;;  %p1904_p8 = pneg %p1903_p4 }
  0x5a   : > { %971 = vmatpush.bf16.msrb.mxu0 %v1676_v53  ;;  %v1707_v53 = vld [vmem:[#allocation7 + $0x20] sm:$0xff] }
  0x5b   : > { %990 = vmatpush.bf16.msrb.mxu1 %v1684_v54  ;;  %p1909_p10 = pnand %p1908_p9, %p1904_p8 }
  0x5c   : > { %1009 = vmatpush.bf16.msrb.mxu2 %v1692_v52  ;;  %v1708_v52 = vld [vmem:[#allocation7 + $0x28] sm:$0xff] }
  0x5d   : > { %1028 = vmatpush.bf16.msrb.mxu3 %v1700_v55 }
  0x5e   : > { %972 = vmatpush.bf16.msrb.mxu0 %v1675_v57 }
  0x5f   : > { %991 = vmatpush.bf16.msrb.mxu1 %v1683_v58  ;;  %v1706_v58 = vld [vmem:[#allocation7 + $0x18] sm:$0xff] }
  0x60   : > { %1010 = vmatpush.bf16.msrb.mxu2 %v1691_v56 }
  0x61   : > { %1029 = vmatpush.bf16.msrb.mxu3 %v1699_v59  ;;  %906 = vmatmul.bf16.gmra.mxu0 %v1299_v6  ;;  %v1705_v59 = vld [vmem:[#allocation7 + $0x10] sm:$0xff] }
  0x62   : > { %973 = vmatpush.bf16.msrb.mxu0 %v1674_v5  ;;  %925 = vmatmul.bf16.gmra.mxu1 %v1303_v7 }
  0x63   : > { %944 = vmatmul.bf16.gmra.mxu2 %v1307_v8  ;;  %992 = vmatpush.bf16.msrb.mxu1 %v1682_v10 }
  0x64   : > { %1011 = vmatpush.bf16.msrb.mxu2 %v1690_v4  ;;  %963 = vmatmul.bf16.gmra.mxu3 %v1311_v9 }
  0x65   : > { %1030 = vmatpush.bf16.msrb.mxu3 %v1698_v11 }
  0x66   : > { %974 = vmatpush.bf16.msrb.mxu0 %v1673_v13 }
  0x67   : > { %993 = vmatpush.bf16.msrb.mxu1 %v1681_v14 }
  0x68   : > { %1012 = vmatpush.bf16.msrb.mxu2 %v1689_v12 }
  0x69   : > { %1031 = vmatpush.bf16.msrb.mxu3 %v1697_v15 }
  0x6a   : > { %975 = vmatpush.bf16.msrb.mxu0 %v1672_v17 }
  0x6b   : > { %994 = vmatpush.bf16.msrb.mxu1 %v1680_v18 }
  0x6c   : > { %1013 = vmatpush.bf16.msrb.mxu2 %v1688_v16 }
  0x6d   : > { %1032 = vmatpush.bf16.msrb.mxu3 %v1696_v19 }
  0x6e   : > { %976 = vmatpush.bf16.msrb.mxu0 %v1671_v21 }
  0x6f   : > { %995 = vmatpush.bf16.msrb.mxu1 %v1679_v22 }
  0x70   : > { %1014 = vmatpush.bf16.msrb.mxu2 %v1687_v20 }
  0x71   : > { %1033 = vmatpush.bf16.msrb.mxu3 %v1695_v23  ;;  %977 = vmatmul.bf16.vlgmr.msrb.gmra.mxu0 %v1283_v32 }
  0x72   : > { %996 = vmatmul.bf16.vlgmr.msrb.gmra.mxu1 %v1287_v33  ;;  %1119 = vmatpush.bf16.msra.mxu0 %v1710_v48 }
  0x73   : > { %1015 = vmatmul.bf16.vlgmr.msrb.gmra.mxu2 %v1291_v34  ;;  %1712 = vmatpush.bf16.msra.mxu1 %v1710_v48 }
  0x74   : > { %1034 = vmatmul.bf16.vlgmr.msrb.gmra.mxu3 %v1295_v35 }
  0x76   : > { %1120 = vmatpush.bf16.msra.mxu0 %v1709_v49 }
  0x77   : > { %1713 = vmatpush.bf16.msra.mxu1 %v1709_v49 }
  0x7a   : > { %1121 = vmatpush.bf16.msra.mxu0 %v1708_v52 }
  0x7b   : > { %1714 = vmatpush.bf16.msra.mxu1 %v1708_v52 }
  0x7e   : > { %1122 = vmatpush.bf16.msra.mxu0 %v1707_v53 }
  0x7f   : > { %1715 = vmatpush.bf16.msra.mxu1 %v1707_v53 }
  0x81   : > { %982 = vmatmul.bf16.gmra.mxu0 %v1315_v44 }
  0x82   : > { %1001 = vmatmul.bf16.gmra.mxu1 %v1319_v45  ;;  %1123 = vmatpush.bf16.msra.mxu0 %v1706_v58 }
  0x83   : > { %1020 = vmatmul.bf16.gmra.mxu2 %v1323_v46  ;;  %1716 = vmatpush.bf16.msra.mxu1 %v1706_v58 }
  0x84   : > { %1039 = vmatmul.bf16.gmra.mxu3 %v1327_v47 }
  0x86   : > { %1124 = vmatpush.bf16.msra.mxu0 %v1705_v59 }
  0x87   : > { %1717 = vmatpush.bf16.msra.mxu1 %v1705_v59 }
  0x8a   : > { %1125 = vmatpush.bf16.msra.mxu0 %v1704_v0 }
  0x8b   : > { %1718 = vmatpush.bf16.msra.mxu1 %v1704_v0 }
  0x8e   : > { %1126 = vmatpush.bf16.msra.mxu0 %v1703_v2 }
  0x8f   : > { %1719 = vmatpush.bf16.msra.mxu1 %v1703_v2 }
  0xce   : > { %v902_v50 = vpop.f32.mrf.mxu0 }
  0xcf   : > { %v921_v51 = vpop.f32.mrf.mxu1  ;;  %v903_v5 = vadd.f32 %v1793_v1, %v902_v50 }
  0xd1   : > { %v922_v8 = vadd.f32 %v921_v51, %v903_v5 }
  0xd6   : > { %v940_v54 = vpop.f32.mrf.mxu2  ;;  %v904_v56 = vpop.f32.mrf.mxu0 }
  0xd7   : > { %v959_v55 = vpop.f32.mrf.mxu3  ;;  %v923_v57 = vpop.f32.mrf.mxu1  ;;  %v905_v9 = vadd.f32 %v1793_v1, %v904_v56  ;;  %v941_v12 = vadd.f32 %v940_v54, %v922_v8 }
  0xd9   : > { %v924_v15 = vadd.f32 %v923_v57, %v905_v9  ;;  %v960_v16 = vadd.f32 %v959_v55, %v941_v12 }
  0xde   : > { %v942_v60 = vpop.f32.mrf.mxu2  ;;  %v907_v62 = vpop.f32.mrf.mxu0 }
  0xdf   : > { %v961_v61 = vpop.f32.mrf.mxu3  ;;  %v926_v63 = vpop.f32.mrf.mxu1  ;;  %v943_v17 = vadd.f32 %v942_v60, %v924_v15  ;;  %v908_v21 = vadd.f32 %v1793_v1, %v907_v62 }
  0xe1   : > { %v962_v20 = vadd.f32 %v961_v61, %v943_v17  ;;  %v927_v27 = vadd.f32 %v926_v63, %v908_v21  ;;  %v1794_v63 = vld [vmem:[%s2181_s4] ss:$0 sm:$0xff] }
  0xe6   : > { %v945_v3 = vpop.f32.mrf.mxu2  ;;  %v909_v6 = vpop.f32.mrf.mxu0 }
  0xe7   : > { %v964_v4 = vpop.f32.mrf.mxu3  ;;  %v928_v7 = vpop.f32.mrf.mxu1  ;;  %v910_v29 = vadd.f32 %v1793_v1, %v909_v6  ;;  %v946_v32 = vadd.f32 %v945_v3, %v927_v27 }
  0xe9   : > { %v929_v37 = vadd.f32 %v928_v7, %v910_v29  ;;  %v965_v40 = vadd.f32 %v964_v4, %v946_v32 }
  0xee   : > { %v947_v10 = vpop.f32.mrf.mxu2  ;;  %v978_v13 = vpop.f32.mrf.mxu0 }
  0xef   : > { %v966_v11 = vpop.f32.mrf.mxu3  ;;  %v997_v14 = vpop.f32.mrf.mxu1  ;;  %v979_v18 = vadd.f32 %v978_v13, %v960_v16  ;;  %v948_v41 = vadd.f32 %v947_v10, %v929_v37 }
  0xf1   : > { %v998_v25 = vadd.f32 %v997_v14, %v979_v18  ;;  %v967_v47 = vadd.f32 %v966_v11, %v948_v41 }
  0xf6   : > { %v1016_v19 = vpop.f32.mrf.mxu2  ;;  %v980_v23 = vpop.f32.mrf.mxu0 }
  0xf7   : > { %v1035_v22 = vpop.f32.mrf.mxu3  ;;  %v999_v24 = vpop.f32.mrf.mxu1  ;;  %v981_v26 = vadd.f32 %v980_v23, %v962_v20  ;;  %v1017_v28 = vadd.f32 %v1016_v19, %v998_v25 }
  0xf9   : > { %v1000_v30 = vadd.f32 %v999_v24, %v981_v26  ;;  %v1036_v33 = vadd.f32 %v1035_v22, %v1017_v28 }
  0xfb   : > { %v1045_v42 = vmax.f32 %v1036_v33, 0.0 }
  0xfe   : > { %v1018_v31 = vpop.f32.mrf.mxu2  ;;  %v983_v36 = vpop.f32.mrf.mxu0 }
  0xff   : > { %v1019_v34 = vadd.f32 %v1018_v31, %v1000_v30  ;;  %v1037_v35 = vpop.f32.mrf.mxu3  ;;  %v1002_v39 = vpop.f32.mrf.mxu1  ;;  %v984_v45 = vadd.f32 %v983_v36, %v965_v40 }
 0x101   : > { %v1038_v38 = vadd.f32 %v1037_v35, %v1019_v34  ;;  %v1003_v50 = vadd.f32 %v1002_v39, %v984_v45 }
 0x103   : > { %v1046_v43 = vmax.f32 %v1038_v38, 0.0 }
 0x105   : > { %v1049_v44 = vpack.c.bf16 %v1046_v43, %v1045_v42 }
 0x106   : > { %v1021_v46 = vpop.f32.mrf.mxu2  ;;  %v985_v49 = vpop.f32.mrf.mxu0 }
 0x107   : > { %v1040_v48 = vpop.f32.mrf.mxu3  ;;  %1127 = vmatmul.bf16.vlgmr.msra.gmra.mxu0 %v1049_v44  ;;  %v986_v51 = vadd.f32 %v985_v49, %v967_v47  ;;  %v1022_v52 = vadd.f32 %v1021_v46, %v1003_v50  ;;  %v1004_v53 = vpop.f32.mrf.mxu1 }
 0x109   : > { %v1005_v54 = vadd.f32 %v1004_v53, %v986_v51  ;;  %v1041_v56 = vadd.f32 %v1040_v48, %v1022_v52 }
 0x10b   : > { %v1047_v60 = vmax.f32 %v1041_v56, 0.0 }
 0x10e   : > { %v1023_v55 = vpop.f32.mrf.mxu2 }
 0x10f   : > { %v1024_v57 = vadd.f32 %v1023_v55, %v1005_v54  ;;  %v1042_v58 = vpop.f32.mrf.mxu3 }
 0x111   : > { %v1043_v59 = vadd.f32 %v1042_v58, %v1024_v57 }
 0x113   : > { %v1048_v61 = vmax.f32 %v1043_v59, 0.0 }
 0x115   : > { %v1050_v62 = vpack.c.bf16 %v1048_v61, %v1047_v60 }
 0x117   : > { %1132 = vmatmul.bf16.vlgmr.msra.gmra.mxu1 %v1050_v62 }
 0x184   : > { %v1128_v0 = vpop.f32.mrf.mxu0 }
 0x185   : > { %v1129_v1 = vadd.f32 %v1794_v63, %v1128_v0 }
 0x187   : > { %1138 = vst [vmem:[%s278_s12] sm:$0xff] %v1129_v1 }
 0x18c   : > { %v1130_v2 = vpop.f32.mrf.mxu0 }
 0x18d   : > { %v1131_v3 = vadd.f32 %v1794_v63, %v1130_v2 }
 0x18f   : > { %1139 = vst [vmem:[%s278_s12 + $0x8] sm:$0xff] %v1131_v3 }
 0x194   : > { %v1133_v4 = vpop.f32.mrf.mxu1 }
 0x195   : > { %v1134_v5 = vadd.f32 %v1794_v63, %v1133_v4 }
 0x197   : > { %1140 = vst [vmem:[%s278_s12 + $0x10] sm:$0xff] %v1134_v5 }
 0x19c   : > { %v1135_v6 = vpop.f32.mrf.mxu1 }
 0x19d   : > { %v1136_v7 = vadd.f32 %v1794_v63, %v1135_v6 }
 0x19f   : > { %1141 = vst [vmem:[%s278_s12 + $0x18] sm:$0xff] %v1136_v7 }
 0x1a0   : > { %1912 = shalt.err (!%p1909_p10)
}
 0x1a1   : > { %s1963_s8 = smov 128   ;;  %s1964_s11 = smov 8  }
 0x1a2   : > { %1730 = dma.vmem_to_hbm [thread:$0]  (%p2061_p3), %s1156_s26, 512, %s1158_s7, %s1143_s16, %s1963_s8, %s1963_s8, %s1964_s11  }
 0x1a3 PF: > { %s1172_s12 = sand.u32 1, %s1943_s18   ;;  %p2188_p12 = scmp.ge.s32.totalorder %s1955_s21, 2 }
 0x1a4   : > { %s1173_s27 = scalar_lea.sflag [#allocation4], %s1172_s12 }
 0x1a5   : > { %p1744_p13 = pnand %p2188_p12, %p2030_p6 }
 0x1a7   : > { %p1745_p0 = pneg %p1744_p13 }
 0x1a9   : > { %1938 = dma.done.wait (%p1745_p0), %s1173_s27, 512  }
 0x1aa   : > { %1940 = vsyncadd (%p1745_p0), %s1173_s27, 4294966784  ;;  %p19_p5 = scmp.ge.s32.totalorder %s2051_s14, 4   ;;  %s2189_s18 = smov %s1947_s19 }
 0x1ab   : > { %s2190_s19 = smov %s1951_s20  ;;  %s2191_s20 = smov %s2067_s23 }
 0x1ac   : > { %s2192_s21 = smov %s2051_s14  ;;  %21 = sbr.rel (!%p19_p5) target bundleno = 6 (0x6), region = 93 }
 0x1b1   :  { %1179 = vsyncpa [#allocation3], 1 }
 0x1b2   :  { %1181 = vsyncpa [#allocation3 + $0x1], 1 }
 0x1b3   :  { %1182 = vsyncpa [#allocation6], 1 }
 0x1b4   :  { %1183 = vsyncpa [#allocation4], 1 }
 0x1b5   :  { %1185 = vsyncpa [#allocation4 + $0x1], 1 }

</bundles_post_ra>
